<compile_context>
chip_gen: v6e
topology: v6e:2x2x1
jax: 0.10.0
libtpu: 0.0.40
codegen_flags: <defaults>
</compile_context>

<pallas_src>
import jax
import jax.numpy as jnp
from jax.experimental import pallas as pl
from jax.experimental.pallas import tpu as pltpu

LN_EPS = 1e-5  # torch.nn.LayerNorm default


def _layernorm(x, gamma, beta):
    # x: (B, F) f32 ; gamma/beta: (1, F). Biased variance, eps inside sqrt (torch).
    mean = jnp.mean(x, axis=-1, keepdims=True)
    centered = x - mean
    var = jnp.mean(centered * centered, axis=-1, keepdims=True)
    return centered * jax.lax.rsqrt(var + LN_EPS) * gamma + beta


def _lstm_scan_kernel(x_ref, hc0_ref, w_ref, lng_ref, lnc_ref,
                      ys_ref, hc_ref, h_scr, c_scr):
    H = h_scr.shape[1]
    t = pl.program_id(1)

    @pl.when(t == 0)
    def _init():
        hc0 = hc0_ref[...].astype(jnp.float32)
        h_scr[...] = hc0[:, :H]
        c_scr[...] = hc0[:, H:]

    h = h_scr[...]
    c = c_scr[...]

    # Single fused MXU matmul: [x | h] @ block_diag(w_ih^T, w_hh^T) -> (B, 8H).
    xh = jnp.concatenate([x_ref[0].astype(jnp.float32), h], axis=-1)
    gates_raw = jnp.dot(xh.astype(w_ref.dtype), w_ref[...],
                        preferred_element_type=jnp.float32)

    igates = _layernorm(gates_raw[:, :4 * H], lng_ref[0:1, :], lng_ref[1:2, :])
    hgates = _layernorm(gates_raw[:, 4 * H:], lng_ref[2:3, :], lng_ref[3:4, :])
    gates = igates + hgates                                   # (B, 4H)

    # Full-width activations (one sigmoid + one tanh over the whole vreg),
    # lane-select the cellgate column range.
    lane = jax.lax.broadcasted_iota(jnp.int32, gates.shape, 1)
    is_cell = jnp.logical_and(lane >= 2 * H, lane < 3 * H)
    act = jnp.where(is_cell, jnp.tanh(gates), jax.nn.sigmoid(gates))

    ingate = act[:, 0 * H:1 * H]
    forgetgate = act[:, 1 * H:2 * H]
    cellgate = act[:, 2 * H:3 * H]
    outgate = act[:, 3 * H:4 * H]

    cy = _layernorm(forgetgate * c + ingate * cellgate,
                    lnc_ref[0:1, :], lnc_ref[1:2, :])
    hy = outgate * jnp.tanh(cy)

    # carry
    h_scr[...] = hy
    c_scr[...] = cy

    # outputs: per-step hidden, plus resident final (hy|cy) slab (one DMA)
    ys_ref[0] = hy.astype(ys_ref.dtype)
    hc_ref[...] = jnp.concatenate([hy, cy], axis=-1).astype(hc_ref.dtype)


def _vmem_limit_bytes(block_bytes):
    # double-buffer headroom + compiler scratch; capped at 64MB for v7x VMEM.
    return int(min(max(2 * block_bytes + (4 << 20), 16 << 20), 64 << 20))


def prepare_params(params, compute_dtype=jnp.bfloat16):
    """One-time packing (hoists transpose / dtype cast out of the hot path)."""
    wih = params["weight_ih"]                # (4H, I)
    whh = params["weight_hh"]                # (4H, H)
    fourH, I = wih.shape
    H = whh.shape[1]
    assert fourH == 4 * H

    # Block-diagonal fused RHS: (I+H, 8H), bf16 for the MXU.
    w_cat = jnp.zeros((I + H, 2 * fourH), dtype=compute_dtype)
    w_cat = w_cat.at[:I, :fourH].set(wih.T.astype(compute_dtype))
    w_cat = w_cat.at[I:, fourH:].set(whh.T.astype(compute_dtype))

    ln_gates = jnp.stack([params["ln_i_w"], params["ln_i_b"],
                          params["ln_h_w"], params["ln_h_b"]]).astype(jnp.float32)  # (4, 4H)
    ln_cell = jnp.stack([params["ln_c_w"], params["ln_c_b"]]).astype(jnp.float32)   # (2, H)

    return {"w_cat": w_cat, "ln_gates": ln_gates, "ln_cell": ln_cell,
            "input_size": I, "hidden_size": H}


def layernorm_lstm_scan(xs, state, kparams, *, b_block=None):
    """Run the cell over a whole sequence in ONE pallas_call.

    xs: (T, B, I);  state = (h0, c0) each (B, H).
    Returns (ys: (T, B, H), (hT, cT)).
    """
    h0, c0 = state
    T, B, I = xs.shape
    H = h0.shape[1]
    w = kparams["w_cat"]
    lng = kparams["ln_gates"]
    lnc = kparams["ln_cell"]
    assert w.shape == (I + H, 8 * H)

    b_blk = B if b_block is None else b_block
    assert B % b_blk == 0 and (b_blk == B or b_blk % 8 == 0)
    nb = B // b_blk

    out_dtype = xs.dtype
    hc0 = jnp.concatenate([h0, c0], axis=1).astype(out_dtype)   # (B, 2H)

    osz = jnp.dtype(out_dtype).itemsize
    block_bytes = (b_blk * I * xs.dtype.itemsize          # x block
                   + b_blk * 2 * H * hc0.dtype.itemsize   # hc0 block
                   + w.size * w.dtype.itemsize            # resident weights
                   + lng.size * 4 + lnc.size * 4          # resident LN params
                   + b_blk * H * osz                      # ys block
                   + b_blk * 2 * H * osz                  # hc block
                   + 2 * b_blk * H * 4)                   # f32 carry scratch

    ys, hc = pl.pallas_call(
        _lstm_scan_kernel,
        out_shape=(
            jax.ShapeDtypeStruct((T, B, H), out_dtype),
            jax.ShapeDtypeStruct((B, 2 * H), out_dtype),
        ),
        grid_spec=pltpu.PrefetchScalarGridSpec(
            num_scalar_prefetch=0,
            grid=(nb, T),
            in_specs=[
                pl.BlockSpec((1, b_blk, I), lambda b, t: (t, b, 0)),   # x_t, streamed
                pl.BlockSpec((b_blk, 2 * H), lambda b, t: (b, 0)),     # (h0|c0), read @ t=0
                pl.BlockSpec((I + H, 8 * H), lambda b, t: (0, 0)),     # weights, resident
                pl.BlockSpec((4, 4 * H), lambda b, t: (0, 0)),         # gate LN, resident
                pl.BlockSpec((2, H), lambda b, t: (0, 0)),             # cell LN, resident
            ],
            out_specs=(
                pl.BlockSpec((1, b_blk, H), lambda b, t: (t, b, 0)),   # ys
                pl.BlockSpec((b_blk, 2 * H), lambda b, t: (b, 0)),     # final (hy|cy)
            ),
            scratch_shapes=[
                pltpu.VMEM((b_blk, H), jnp.float32),   # h carry
                pltpu.VMEM((b_blk, H), jnp.float32),   # c carry
            ],
        ),
        compiler_params=pltpu.CompilerParams(
            dimension_semantics=("parallel", "arbitrary"),
            vmem_limit_bytes=_vmem_limit_bytes(block_bytes),
        ),
    )(xs, hc0, w, lng, lnc)

    return ys, (hc[:, :H], hc[:, H:])


def layernorm_lstm_cell(x, state, kparams):
    """Single-step forward matching the PyTorch module: returns (hy, (hy, cy))."""
    _, (hy, cy) = layernorm_lstm_scan(x[None], state, kparams)
    return hy, (hy, cy)


def init_params(key, input_size, hidden_size):
    k_ih, k_hh = jax.random.split(key)
    return {
        # nn.Parameter(torch.randn(...)) -> standard normal
        "weight_ih": jax.random.normal(k_ih, (4 * hidden_size, input_size), jnp.float32),
        "weight_hh": jax.random.normal(k_hh, (4 * hidden_size, hidden_size), jnp.float32),
        # nn.LayerNorm default init: weight = 1, bias = 0
        "ln_i_w": jnp.ones((4 * hidden_size,), jnp.float32),
        "ln_i_b": jnp.zeros((4 * hidden_size,), jnp.float32),
        "ln_h_w": jnp.ones((4 * hidden_size,), jnp.float32),
        "ln_h_b": jnp.zeros((4 * hidden_size,), jnp.float32),
        "ln_c_w": jnp.ones((hidden_size,), jnp.float32),
        "ln_c_b": jnp.zeros((hidden_size,), jnp.float32),
    }


# ------------------------- pure-JAX references ------------------------------

def _cell_ref_f32(x, state, params):
    """Exact f32 mirror of the PyTorch module (original weight layout)."""
    h, c = state
    H = h.shape[1]
    igates = _layernorm(x @ params["weight_ih"].T,
                        params["ln_i_w"][None], params["ln_i_b"][None])
    hgates = _layernorm(h @ params["weight_hh"].T,
                        params["ln_h_w"][None], params["ln_h_b"][None])
    gates = igates + hgates
    ig, fg, cg, og = (gates[:, i * H:(i + 1) * H] for i in range(4))
    ig, fg, og = jax.nn.sigmoid(ig), jax.nn.sigmoid(fg), jax.nn.sigmoid(og)
    cg = jnp.tanh(cg)
    cy = _layernorm(fg * c + ig * cg, params["ln_c_w"][None], params["ln_c_b"][None])
    hy = og * jnp.tanh(cy)
    return hy, cy


def _cell_ref_matched(x, state, kparams):
    """Same dtype policy as the kernel (bf16 MXU inputs, f32 elsewhere)."""
    h, c = state
    H = h.shape[1]
    w, lng, lnc = kparams["w_cat"], kparams["ln_gates"], kparams["ln_cell"]
    xh = jnp.concatenate([x.astype(jnp.float32), h.astype(jnp.float32)], axis=-1)
    gates_raw = jnp.dot(xh.astype(w.dtype), w, preferred_element_type=jnp.float32)
    igates = _layernorm(gates_raw[:, :4 * H], lng[0:1], lng[1:2])
    hgates = _layernorm(gates_raw[:, 4 * H:], lng[2:3], lng[3:4])
    gates = igates + hgates
    ig, fg, cg, og = (gates[:, i * H:(i + 1) * H] for i in range(4))
    ig, fg, og = jax.nn.sigmoid(ig), jax.nn.sigmoid(fg), jax.nn.sigmoid(og)
    cg = jnp.tanh(cg)
    cy = _layernorm(fg * c.astype(jnp.float32) + ig * cg, lnc[0:1], lnc[1:2])
    hy = og * jnp.tanh(cy)
    return hy, cy


if __name__ == "__main__":
    input_size, hidden_size, batch, seq = 16, 32, 8, 8

    key = jax.random.PRNGKey(0)
    k_p, k_x, k_h, k_c, k_s = jax.random.split(key, 5)

    params = init_params(k_p, input_size, hidden_size)
    kparams = prepare_params(params)        # one-time: transpose/pack/cast hoisted

    x = jax.random.normal(k_x, (batch, input_size), jnp.float32)
    hx = jax.random.normal(k_h, (batch, hidden_size), jnp.float32)
    cx = jax.random.normal(k_c, (batch, hidden_size), jnp.float32)

    # ---- single-step cell (module semantics) ----
    hy, (hy2, cy) = layernorm_lstm_cell(x, (hx, cx), kparams)
    jax.block_until_ready((hy, hy2, cy))

    hy_m, cy_m = _cell_ref_matched(x, (hx, cx), kparams)
    assert jnp.allclose(hy, hy_m, atol=2e-3, rtol=2e-3), "hy mismatch (matched ref)"
    assert jnp.allclose(cy, cy_m, atol=2e-3, rtol=2e-3), "cy mismatch (matched ref)"

    hy_f, cy_f = _cell_ref_f32(x, (hx, cx), params)
    assert jnp.allclose(hy, hy_f, atol=5e-2, rtol=5e-2), "hy mismatch (f32 ref)"
    assert jnp.allclose(cy, cy_f, atol=5e-2, rtol=5e-2), "cy mismatch (f32 ref)"

    # ---- full sequence in one pallas_call (amortized launch / resident weights) ----
    xs = jax.random.normal(k_s, (seq, batch, input_size), jnp.float32)
    ys, (hT, cT) = layernorm_lstm_scan(xs, (hx, cx), kparams)
    jax.block_until_ready((ys, hT, cT))

    h_r, c_r = hx, cx
    ys_rows = []
    for t in range(seq):
        h_r, c_r = _cell_ref_matched(xs[t], (h_r, c_r), kparams)
        ys_rows.append(h_r)
    ys_ref = jnp.stack(ys_rows)
    assert jnp.allclose(ys, ys_ref, atol=5e-3, rtol=5e-3), "ys mismatch (seq)"
    assert jnp.allclose(hT, ys_ref[-1], atol=5e-3, rtol=5e-3), "hT mismatch (seq)"
    assert jnp.allclose(cT, c_r, atol=5e-3, rtol=5e-3), "cT mismatch (seq)"

    print("KERNEL_OK")
</pallas_src>

<mosaic_0001>
module attributes {stable_mosaic.version = 11 : i64} {
  func.func @_lstm_scan_kernel(%arg0: i32, %arg1: i32, %arg2: memref<1x8x16xf32, #tpu.memory_space<vmem>>, %arg3: memref<8x64xf32, #tpu.memory_space<vmem>>, %arg4: memref<48x256xbf16, #tpu.memory_space<vmem>>, %arg5: memref<4x128xf32, #tpu.memory_space<vmem>>, %arg6: memref<2x32xf32, #tpu.memory_space<vmem>>, %arg7: memref<1x8x32xf32, #tpu.memory_space<vmem>>, %arg8: memref<8x64xf32, #tpu.memory_space<vmem>>, %arg9: memref<8x32xf32, #tpu.memory_space<vmem>>, %arg10: memref<8x32xf32, #tpu.memory_space<vmem>>) attributes {dimension_semantics = [#tpu.dimension_semantics<parallel>, #tpu.dimension_semantics<arbitrary>], iteration_bounds = array<i64: 1, 1>, scalar_prefetch = 0 : i64, scratch_operands = 2 : i64, tpu.core_type = #tpu.core_type<tc>, window_params = [{transform_indices = @transform_0, window_bounds = array<i64: 1, 8, 16>}, {transform_indices = @transform_1, window_bounds = array<i64: 8, 64>}, {pipeline_mode = #tpu.pipeline_mode<synchronous>, transform_indices = @transform_2, window_bounds = array<i64: 48, 256>}, {pipeline_mode = #tpu.pipeline_mode<synchronous>, transform_indices = @transform_3, window_bounds = array<i64: 4, 128>}, {pipeline_mode = #tpu.pipeline_mode<synchronous>, transform_indices = @transform_4, window_bounds = array<i64: 2, 32>}, {transform_indices = @transform_5, window_bounds = array<i64: 1, 8, 32>}, {transform_indices = @transform_6, window_bounds = array<i64: 8, 64>}]} {
    %c0_i32 = arith.constant 0 : i32
    %0 = arith.cmpi eq, %arg1, %c0_i32 : i32
    %1 = arith.extui %0 : i1 to i32
    %c0_i32_0 = arith.constant 0 : i32
    %2 = arith.cmpi ne, %1, %c0_i32_0 : i32
    scf.if %2 {
      %c0_43 = arith.constant 0 : index
      %c0_44 = arith.constant 0 : index
      %109 = vector.load %arg3[%c0_43, %c0_44] : memref<8x64xf32, #tpu.memory_space<vmem>>, vector<8x64xf32>
      %110 = vector.extract_strided_slice %109 {offsets = [0, 0], sizes = [8, 32], strides = [1, 1]} : vector<8x64xf32> to vector<8x32xf32>
      %c0_45 = arith.constant 0 : index
      %c0_46 = arith.constant 0 : index
      %111 = vector.load %arg9[%c0_45, %c0_46] : memref<8x32xf32, #tpu.memory_space<vmem>>, vector<8x32xf32>
      tpu.vector_store %arg9[%c0_45, %c0_46], %110 {strides = array<i32>} : memref<8x32xf32, #tpu.memory_space<vmem>>, vector<8x32xf32>,
      %112 = vector.extract_strided_slice %109 {offsets = [0, 32], sizes = [8, 32], strides = [1, 1]} : vector<8x64xf32> to vector<8x32xf32>
      %c0_47 = arith.constant 0 : index
      %c0_48 = arith.constant 0 : index
      %113 = vector.load %arg10[%c0_47, %c0_48] : memref<8x32xf32, #tpu.memory_space<vmem>>, vector<8x32xf32>
      tpu.vector_store %arg10[%c0_47, %c0_48], %112 {strides = array<i32>} : memref<8x32xf32, #tpu.memory_space<vmem>>, vector<8x32xf32>,
    } else {
    }
    %c0 = arith.constant 0 : index
    %c0_1 = arith.constant 0 : index
    %3 = vector.load %arg9[%c0, %c0_1] : memref<8x32xf32, #tpu.memory_space<vmem>>, vector<8x32xf32>
    %c0_2 = arith.constant 0 : index
    %c0_3 = arith.constant 0 : index
    %4 = vector.load %arg10[%c0_2, %c0_3] : memref<8x32xf32, #tpu.memory_space<vmem>>, vector<8x32xf32>
    %c0_4 = arith.constant 0 : index
    %c0_5 = arith.constant 0 : index
    %c0_6 = arith.constant 0 : index
    %5 = vector.load %arg2[%c0_4, %c0_5, %c0_6] : memref<1x8x16xf32, #tpu.memory_space<vmem>>, vector<1x8x16xf32>
    %6 = vector.shape_cast %5 : vector<1x8x16xf32> to vector<8x16xf32>
    %7 = tpu.concatenate %6, %3 in 1 : vector<8x16xf32>, vector<8x32xf32> -> vector<8x48xf32>
    %8 = arith.truncf %7 : vector<8x48xf32> to vector<8x48xbf16>
    %c0_7 = arith.constant 0 : index
    %c0_8 = arith.constant 0 : index
    %9 = vector.load %arg4[%c0_7, %c0_8] : memref<48x256xbf16, #tpu.memory_space<vmem>>, vector<48x256xbf16>
    %cst = arith.constant dense<0.000000e+00> : vector<8x256xf32>
    %10 = tpu.matmul %8, %9, %cst {dimension_numbers = #tpu.dot_dimension_numbers<[1], [0], [0], [1], [0, 0, 1, 1], [], []>} : vector<8x48xbf16>, vector<48x256xbf16>, vector<8x256xf32> -> vector<8x256xf32>
    %11 = vector.extract_strided_slice %10 {offsets = [0, 0], sizes = [8, 128], strides = [1, 1]} : vector<8x256xf32> to vector<8x128xf32>
    %c0_9 = arith.constant 0 : index
    %c0_10 = arith.constant 0 : index
    %12 = vector.load %arg5[%c0_9, %c0_10] : memref<4x128xf32, #tpu.memory_space<vmem>>, vector<1x128xf32>
    %c1 = arith.constant 1 : index
    %c0_11 = arith.constant 0 : index
    %13 = vector.load %arg5[%c1, %c0_11] : memref<4x128xf32, #tpu.memory_space<vmem>>, vector<1x128xf32>
    %cst_12 = arith.constant dense<0.000000e+00> : vector<8xf32>
    %14 = vector.multi_reduction <add>, %11, %cst_12 [1] : vector<8x128xf32> to vector<8xf32>
    %15 = vector.shape_cast %14 : vector<8xf32> to vector<8x1xf32>
    %cst_13 = arith.constant 1.280000e+02 : f32
    %16 = vector.broadcast %cst_13 : f32 to vector<8x1xf32>
    %17 = arith.divf %15, %16 : vector<8x1xf32>
    %18 = vector.broadcast %17 : vector<8x1xf32> to vector<8x128xf32>
    %19 = arith.subf %11, %18 : vector<8x128xf32>
    %20 = arith.mulf %19, %19 : vector<8x128xf32>
    %cst_14 = arith.constant dense<0.000000e+00> : vector<8xf32>
    %21 = vector.multi_reduction <add>, %20, %cst_14 [1] : vector<8x128xf32> to vector<8xf32>
    %22 = vector.shape_cast %21 : vector<8xf32> to vector<8x1xf32>
    %cst_15 = arith.constant 1.280000e+02 : f32
    %23 = vector.broadcast %cst_15 : f32 to vector<8x1xf32>
    %24 = arith.divf %22, %23 : vector<8x1xf32>
    %cst_16 = arith.constant 9.99999974E-6 : f32
    %25 = vector.broadcast %cst_16 : f32 to vector<8x1xf32>
    %26 = arith.addf %24, %25 : vector<8x1xf32>
    %27 = math.rsqrt %26 : vector<8x1xf32>
    %28 = vector.broadcast %27 : vector<8x1xf32> to vector<8x128xf32>
    %29 = arith.mulf %19, %28 : vector<8x128xf32>
    %30 = vector.broadcast %12 : vector<1x128xf32> to vector<8x128xf32>
    %31 = arith.mulf %29, %30 : vector<8x128xf32>
    %32 = vector.broadcast %13 : vector<1x128xf32> to vector<8x128xf32>
    %33 = arith.addf %31, %32 : vector<8x128xf32>
    %34 = vector.extract_strided_slice %10 {offsets = [0, 128], sizes = [8, 128], strides = [1, 1]} : vector<8x256xf32> to vector<8x128xf32>
    %c2 = arith.constant 2 : index
    %c0_17 = arith.constant 0 : index
    %35 = vector.load %arg5[%c2, %c0_17] : memref<4x128xf32, #tpu.memory_space<vmem>>, vector<1x128xf32>
    %c3 = arith.constant 3 : index
    %c0_18 = arith.constant 0 : index
    %36 = vector.load %arg5[%c3, %c0_18] : memref<4x128xf32, #tpu.memory_space<vmem>>, vector<1x128xf32>
    %cst_19 = arith.constant dense<0.000000e+00> : vector<8xf32>
    %37 = vector.multi_reduction <add>, %34, %cst_19 [1] : vector<8x128xf32> to vector<8xf32>
    %38 = vector.shape_cast %37 : vector<8xf32> to vector<8x1xf32>
    %cst_20 = arith.constant 1.280000e+02 : f32
    %39 = vector.broadcast %cst_20 : f32 to vector<8x1xf32>
    %40 = arith.divf %38, %39 : vector<8x1xf32>
    %41 = vector.broadcast %40 : vector<8x1xf32> to vector<8x128xf32>
    %42 = arith.subf %34, %41 : vector<8x128xf32>
    %43 = arith.mulf %42, %42 : vector<8x128xf32>
    %cst_21 = arith.constant dense<0.000000e+00> : vector<8xf32>
    %44 = vector.multi_reduction <add>, %43, %cst_21 [1] : vector<8x128xf32> to vector<8xf32>
    %45 = vector.shape_cast %44 : vector<8xf32> to vector<8x1xf32>
    %cst_22 = arith.constant 1.280000e+02 : f32
    %46 = vector.broadcast %cst_22 : f32 to vector<8x1xf32>
    %47 = arith.divf %45, %46 : vector<8x1xf32>
    %cst_23 = arith.constant 9.99999974E-6 : f32
    %48 = vector.broadcast %cst_23 : f32 to vector<8x1xf32>
    %49 = arith.addf %47, %48 : vector<8x1xf32>
    %50 = math.rsqrt %49 : vector<8x1xf32>
    %51 = vector.broadcast %50 : vector<8x1xf32> to vector<8x128xf32>
    %52 = arith.mulf %42, %51 : vector<8x128xf32>
    %53 = vector.broadcast %35 : vector<1x128xf32> to vector<8x128xf32>
    %54 = arith.mulf %52, %53 : vector<8x128xf32>
    %55 = vector.broadcast %36 : vector<1x128xf32> to vector<8x128xf32>
    %56 = arith.addf %54, %55 : vector<8x128xf32>
    %57 = arith.addf %33, %56 : vector<8x128xf32>
    %58 = tpu.iota {dimensions = array<i32: 1>} : vector<8x128xi32>
    %c64_i32 = arith.constant 64 : i32
    %59 = vector.broadcast %c64_i32 : i32 to vector<8x128xi32>
    %60 = arith.cmpi sge, %58, %59 : vector<8x128xi32>
    %c96_i32 = arith.constant 96 : i32
    %61 = vector.broadcast %c96_i32 : i32 to vector<8x128xi32>
    %62 = arith.cmpi slt, %58, %61 : vector<8x128xi32>
    %63 = arith.andi %60, %62 : vector<8x128xi1>
    %64 = math.tanh %57 : vector<8x128xf32>
    %65 = arith.negf %57 : vector<8x128xf32>
    %66 = math.exp %65 : vector<8x128xf32>
    %cst_24 = arith.constant 1.000000e+00 : f32
    %67 = vector.broadcast %cst_24 : f32 to vector<8x128xf32>
    %68 = arith.addf %67, %66 : vector<8x128xf32>
    %69 = arith.divf %67, %68 : vector<8x128xf32>
    %70 = arith.select %63, %64, %69 : vector<8x128xi1>, vector<8x128xf32>
    %71 = vector.extract_strided_slice %70 {offsets = [0, 0], sizes = [8, 32], strides = [1, 1]} : vector<8x128xf32> to vector<8x32xf32>
    %72 = vector.extract_strided_slice %70 {offsets = [0, 32], sizes = [8, 32], strides = [1, 1]} : vector<8x128xf32> to vector<8x32xf32>
    %73 = vector.extract_strided_slice %70 {offsets = [0, 64], sizes = [8, 32], strides = [1, 1]} : vector<8x128xf32> to vector<8x32xf32>
    %74 = vector.extract_strided_slice %70 {offsets = [0, 96], sizes = [8, 32], strides = [1, 1]} : vector<8x128xf32> to vector<8x32xf32>
    %75 = arith.mulf %72, %4 : vector<8x32xf32>
    %76 = arith.mulf %71, %73 : vector<8x32xf32>
    %77 = arith.addf %75, %76 : vector<8x32xf32>
    %c0_25 = arith.constant 0 : index
    %c0_26 = arith.constant 0 : index
    %78 = vector.load %arg6[%c0_25, %c0_26] : memref<2x32xf32, #tpu.memory_space<vmem>>, vector<1x32xf32>
    %c1_27 = arith.constant 1 : index
    %c0_28 = arith.constant 0 : index
    %79 = vector.load %arg6[%c1_27, %c0_28] : memref<2x32xf32, #tpu.memory_space<vmem>>, vector<1x32xf32>
    %cst_29 = arith.constant dense<0.000000e+00> : vector<8xf32>
    %80 = vector.multi_reduction <add>, %77, %cst_29 [1] : vector<8x32xf32> to vector<8xf32>
    %81 = vector.shape_cast %80 : vector<8xf32> to vector<8x1xf32>
    %cst_30 = arith.constant 3.200000e+01 : f32
    %82 = vector.broadcast %cst_30 : f32 to vector<8x1xf32>
    %83 = arith.divf %81, %82 : vector<8x1xf32>
    %84 = vector.broadcast %83 : vector<8x1xf32> to vector<8x32xf32>
    %85 = arith.subf %77, %84 : vector<8x32xf32>
    %86 = arith.mulf %85, %85 : vector<8x32xf32>
    %cst_31 = arith.constant dense<0.000000e+00> : vector<8xf32>
    %87 = vector.multi_reduction <add>, %86, %cst_31 [1] : vector<8x32xf32> to vector<8xf32>
    %88 = vector.shape_cast %87 : vector<8xf32> to vector<8x1xf32>
    %cst_32 = arith.constant 3.200000e+01 : f32
    %89 = vector.broadcast %cst_32 : f32 to vector<8x1xf32>
    %90 = arith.divf %88, %89 : vector<8x1xf32>
    %cst_33 = arith.constant 9.99999974E-6 : f32
    %91 = vector.broadcast %cst_33 : f32 to vector<8x1xf32>
    %92 = arith.addf %90, %91 : vector<8x1xf32>
    %93 = math.rsqrt %92 : vector<8x1xf32>
    %94 = vector.broadcast %93 : vector<8x1xf32> to vector<8x32xf32>
    %95 = arith.mulf %85, %94 : vector<8x32xf32>
    %96 = vector.broadcast %78 : vector<1x32xf32> to vector<8x32xf32>
    %97 = arith.mulf %95, %96 : vector<8x32xf32>
    %98 = vector.broadcast %79 : vector<1x32xf32> to vector<8x32xf32>
    %99 = arith.addf %97, %98 : vector<8x32xf32>
    %100 = math.tanh %99 : vector<8x32xf32>
    %101 = arith.mulf %74, %100 : vector<8x32xf32>
    %c0_34 = arith.constant 0 : index
    %c0_35 = arith.constant 0 : index
    %102 = vector.load %arg9[%c0_34, %c0_35] : memref<8x32xf32, #tpu.memory_space<vmem>>, vector<8x32xf32>
    tpu.vector_store %arg9[%c0_34, %c0_35], %101 {strides = array<i32>} : memref<8x32xf32, #tpu.memory_space<vmem>>, vector<8x32xf32>,
    %c0_36 = arith.constant 0 : index
    %c0_37 = arith.constant 0 : index
    %103 = vector.load %arg10[%c0_36, %c0_37] : memref<8x32xf32, #tpu.memory_space<vmem>>, vector<8x32xf32>
    tpu.vector_store %arg10[%c0_36, %c0_37], %99 {strides = array<i32>} : memref<8x32xf32, #tpu.memory_space<vmem>>, vector<8x32xf32>,
    %c0_38 = arith.constant 0 : index
    %c0_39 = arith.constant 0 : index
    %c0_40 = arith.constant 0 : index
    %104 = vector.load %arg7[%c0_38, %c0_39, %c0_40] : memref<1x8x32xf32, #tpu.memory_space<vmem>>, vector<1x8x32xf32>
    %105 = vector.shape_cast %104 : vector<1x8x32xf32> to vector<8x32xf32>
    %106 = vector.shape_cast %101 : vector<8x32xf32> to vector<1x8x32xf32>
    tpu.vector_store %arg7[%c0_38, %c0_39, %c0_40], %106 {strides = array<i32>} : memref<1x8x32xf32, #tpu.memory_space<vmem>>, vector<1x8x32xf32>,
    %107 = tpu.concatenate %101, %99 in 1 : vector<8x32xf32>, vector<8x32xf32> -> vector<8x64xf32>
    %c0_41 = arith.constant 0 : index
    %c0_42 = arith.constant 0 : index
    %108 = vector.load %arg8[%c0_41, %c0_42] : memref<8x64xf32, #tpu.memory_space<vmem>>, vector<8x64xf32>
    tpu.vector_store %arg8[%c0_41, %c0_42], %107 {strides = array<i32>} : memref<8x64xf32, #tpu.memory_space<vmem>>, vector<8x64xf32>,
    return
  }
  func.func @transform_0(%arg0: i32, %arg1: i32) -> (i32, i32, i32) {
    %c0_i32 = arith.constant 0 : i32
    %c0_i32_0 = arith.constant 0 : i32
    return %arg1, %arg0, %c0_i32 : i32, i32, i32
  }
  func.func @transform_1(%arg0: i32, %arg1: i32) -> (i32, i32) {
    %c0_i32 = arith.constant 0 : i32
    %c0_i32_0 = arith.constant 0 : i32
    return %arg0, %c0_i32 : i32, i32
  }
  func.func @transform_2(%arg0: i32, %arg1: i32) -> (i32, i32) {
    %c0_i32 = arith.constant 0 : i32
    %c0_i32_0 = arith.constant 0 : i32
    %c0_i32_1 = arith.constant 0 : i32
    return %c0_i32, %c0_i32_0 : i32, i32
  }
  func.func @transform_3(%arg0: i32, %arg1: i32) -> (i32, i32) {
    %c0_i32 = arith.constant 0 : i32
    %c0_i32_0 = arith.constant 0 : i32
    %c0_i32_1 = arith.constant 0 : i32
    return %c0_i32, %c0_i32_0 : i32, i32
  }
  func.func @transform_4(%arg0: i32, %arg1: i32) -> (i32, i32) {
    %c0_i32 = arith.constant 0 : i32
    %c0_i32_0 = arith.constant 0 : i32
    %c0_i32_1 = arith.constant 0 : i32
    return %c0_i32, %c0_i32_0 : i32, i32
  }
  func.func @transform_5(%arg0: i32, %arg1: i32) -> (i32, i32, i32) {
    %c0_i32 = arith.constant 0 : i32
    %c0_i32_0 = arith.constant 0 : i32
    return %arg1, %arg0, %c0_i32 : i32, i32, i32
  }
  func.func @transform_6(%arg0: i32, %arg1: i32) -> (i32, i32) {
    %c0_i32 = arith.constant 0 : i32
    %c0_i32_0 = arith.constant 0 : i32
    return %arg0, %c0_i32 : i32, i32
  }
}

</mosaic_0001>

<bundles_post_ra>
// kernel: tpu_custom_call.1
= control target key start
LH: loop header
LB: loop body
LE: loop exit
PB: predicated region body
PF: predicated region fallthrough
CT: control target
= control target key end

     0   :  { %12 = vsyncpa [#allocation5], 0  ;;  %s590_s0 = inlined_call_operand.hbm [shape: f32[1,8,16], index: 0, kind: input, shape index: {}]   ;;  %s591_s1 = inlined_call_operand.hbm [shape: f32[8,64], index: 1, kind: input, shape index: {}]   ;;  %s592_s2 = inlined_call_operand.hbm [shape: bf16[48,256], index: 2, kind: input, shape index: {}]   ;;  %s593_s3 = inlined_call_operand.vmem [shape: f32[4,128], index: 3, kind: input, shape index: {}]   ;;  %s594_s4 = inlined_call_operand.vmem [shape: f32[2,32], index: 4, kind: input, shape index: {}]   ;;  %s595_s5 = inlined_call_operand.hbm [shape: f32[1,8,32], index: 5, kind: output, shape index: {0}]   ;;  %s596_s6 = inlined_call_operand.hbm [shape: f32[8,64], index: 6, kind: output, shape index: {1}]  }
   0x1   :  { %13 = vsyncpa [#allocation8], 0 }
   0x2   :  { %14 = vsyncpa [#allocation6], 0 }
   0x3   :  { %15 = vsyncpa [#allocation12], 0  ;;  %s491_s21 = smov [#allocation7]   ;;  %s492_s23 = smov [#allocation4]  }
   0x4   :  { %s32_s22 = sshll.u32 %s491_s21, 4  ;;  %s22_s24 = sshll.u32 %s492_s23, 4  ;;  %s33_s22 = int_to_ptr.vmem [resolvable:$true] %s32_s22  ;;  %s23_s24 = int_to_ptr.vmem [resolvable:$true] %s22_s24 }
   0x5   :  { %s391_s25 = scalar_lea.vmem %s33_s22, 128  ;;  %p396_p1 = scmp.lt.s32.totalorder %s33_s22, %s33_s22 }
   0x6   :  { %p392_p0 = scmp.ne.s32.totalorder %s33_s22, %s391_s25  ;;  %p397_p2 = scmp.lt.s32.totalorder %s391_s25, %s391_s25 }
   0x8   :  { %p398_p3 = por %p397_p2, %p396_p1 }
   0xa   :  { %p399_p4 = pnand %p398_p3, %p392_p0 }
   0xc   :  { %402 = shalt.err (!%p399_p4)
}
   0xd   :  { %35 = dma.hbm_to_vmem [thread:$0]  %s591_s1, 128, %s33_s22, [#allocation8]  }
   0xe   :  { %s411_s28 = scalar_lea.vmem %s23_s24, 128  ;;  %p416_p6 = scmp.lt.s32.totalorder %s23_s24, %s23_s24 }
   0xf   :  { %p412_p5 = scmp.ne.s32.totalorder %s23_s24, %s411_s28  ;;  %p417_p7 = scmp.lt.s32.totalorder %s411_s28, %s411_s28 }
  0x11   :  { %p418_p8 = por %p417_p7, %p416_p6 }
  0x13   :  { %p419_p9 = pnand %p418_p8, %p412_p5 }
  0x15   :  { %422 = shalt.err (!%p419_p9)
}
  0x16   :  { %25 = dma.hbm_to_vmem [thread:$0]  %s590_s0, 128, %s23_s24, [#allocation5]  }
  0x17   :  { %s493_s7 = smov [#allocation9]  }
  0x18   :  { %s41_s8 = sshll.u32 %s493_s7, 4  ;;  %s42_s8 = int_to_ptr.vmem [resolvable:$true] %s41_s8 }
  0x19   :  { %s431_s9 = scalar_lea.vmem %s42_s8, 768  ;;  %p436_p11 = scmp.lt.s32.totalorder %s42_s8, %s42_s8 }
  0x1a   :  { %p432_p10 = scmp.ne.s32.totalorder %s42_s8, %s431_s9  ;;  %p437_p12 = scmp.lt.s32.totalorder %s431_s9, %s431_s9 }
  0x1c   :  { %p438_p13 = por %p437_p12, %p436_p11 }
  0x1e   :  { %p439_p0 = pnand %p438_p13, %p432_p10 }
  0x20   :  { %442 = shalt.err (!%p439_p0)
}
  0x21   :  { %s494_s1 = smov 128   ;;  %s495_s10 = smov 8  }
  0x22   :  { %47 = dma.hbm_to_vmem [thread:$0]  %s592_s2, 768, %s42_s8, [#allocation8], %s494_s1, %s494_s1, %s495_s10  }
  0x23   :  { %483 = dma.done.wait [#allocation5], 128  }
  0x24   :  { %484 = vsyncadd [#allocation5], 4294967168 }
  0x25   :  { %485 = dma.done.wait [#allocation8], 896  }
  0x26   :  { %486 = vsyncadd [#allocation8], 4294966400  ;;  %vm67_vm0 = vcmask 261120   ;;  %v496_v0 = vmov 0   ;;  %v66_v1 = vld [vmem:[#allocation7] sm:$0xff]  ;;  %s497_s0 = smov 16   ;;  %v213_v48 = vlaneseq }
  0x27   :  { %156 = vmatprep.mubr.bf16.mxu0 %v496_v0  ;;  %68 = vst.msk [vmem:[#allocation2] sm:$0xff] %vm67_vm0, %v66_v1  ;;  %v360_v2 = vld [vmem:[#allocation9 + $0x24] ss:$8 sps:$4 sm:$0xff]   ;;  %v362_v3 = vld [vmem:[#allocation9 + $0x20] ss:$8 sps:$4 sm:$0xff]   ;;  %v76_v9 = vld [vmem:[#allocation4] sm:$0xff] }
  0x28   :  { %v363_v4 = vld [vmem:[#allocation9 + $0x14] ss:$8 sps:$4 sm:$0xff]   ;;  %134 = vmatprep.subr.bf16.mxu0 %v360_v2  ;;  %v365_v5 = vld [vmem:[#allocation9 + $0x10] ss:$8 sps:$4 sm:$0xff]   ;;  %v366_v6 = vld [vmem:[#allocation9 + $0x4] ss:$8 sps:$4 sm:$0xff]  }
  0x29   :  { %135 = vmatpush1.bf16.msra.mxu0 %v362_v3  ;;  %v368_v8 = vld [vmem:[#allocation9] ss:$8 sps:$4 sm:$0xff]   ;;  %vm81_vm1 = vcmask 130048   ;;  %vm120_vm2 = vcmask 392192   ;;  %s498_s2 = smov 96   ;;  %v214_v49 = vand.u32 127, %v213_v48 }
  0x2a   :  { %136 = vmatprep.subr.bf16.mxu0 %v363_v4  ;;  %v341_v34 = vld [vmem:[%s593_s3] ss:$0 sm:$0xff]  ;;  %v343_v36 = vld [vmem:[%s593_s3 + $0x2] ss:$0 sm:$0xff]  ;;  %v342_v39 = vld [vmem:[%s593_s3 + $0x1] ss:$0 sm:$0xff] }
  0x2b   :  { %v344_v40 = vld [vmem:[%s593_s3 + $0x3] ss:$0 sm:$0xff]  ;;  %vm215_vm3 = vcmp.ge.s32.totalorder %v214_v49, 64  ;;  %vm216_vm4 = vcmp.lt.s32.totalorder %v214_v49, 96  ;;  %s499_s21 = smov 64   ;;  %s500_s3 = smov 32  }
  0x2c   :  { %vm217_vm5 = vmand %vm215_vm3, %vm216_vm4  ;;  %v346_v62 = vld [vmem:[%s594_s4] ss:$0 sm:$0xff]  ;;  %s502_s27 = smov [#allocation11]   ;;  %vm302_vm6 = vcmask 523264  }
  0x2d   :  { %137 = vmatpush1.bf16.msra.mxu0 %v365_v5  ;;  %v347_v5 = vld [vmem:[%s594_s4 + $0x1] ss:$0 sm:$0xff]  ;;  %s501_s4 = smov [#allocation10]   ;;  %s320_s28 = sshll.u32 %s502_s27, 4  ;;  %s321_s28 = int_to_ptr.vmem [resolvable:$true] %s320_s28 }
  0x2e   :  { %v74_v7 = vld [vmem:[#allocation2] sm:$0xff]  ;;  %138 = vmatprep.subr.bf16.mxu0 %v366_v6  ;;  %s310_s26 = sshll.u32 %s501_s4, 4  ;;  %s311_s26 = int_to_ptr.vmem [resolvable:$true] %s310_s26 }
  0x2f   :  { %78 = vrot.lane.b32.xlu0 %v74_v7, %s497_s0  ;;  %s443_s29 = scalar_lea.vmem %s311_s26, 128  ;;  %p448_p2 = scmp.lt.s32.totalorder %s311_s26, %s311_s26 }
  0x30   :  { %p444_p1 = scmp.ne.s32.totalorder %s311_s26, %s443_s29  ;;  %p449_p3 = scmp.lt.s32.totalorder %s443_s29, %s443_s29 }
  0x31   :  { %139 = vmatpush1.bf16.msra.mxu0 %v368_v8 }
  0x32   :  { %p450_p4 = por %p449_p3, %p448_p2 }
  0x34   :  { %p451_p5 = pnand %p450_p4, %p444_p1 }
  0xa1   :  { %v79_v10 = vpop.permute.xlu0 %78 }
  0xa2   :  { %v82_v11 = vsel %vm81_vm1, %v76_v9, %v79_v10 }
  0xa3   :  { %v83_v12 = vpack.c.bf16 %v82_v11, %v82_v11 }
  0xa5   :  { %340 = vmatmul.mubr.msk.bf16.vlgmr.msra.gmra.mxu0 %vm120_vm2, %v83_v12 }
 0x165   :  { %v158_v13 = vpop.f32.mrf.mxu0 }
 0x166   :  { %167 = vadd.xlane.f32.xlu0 %v158_v13 }
 0x167   :  { %v160_v14 = vpop.f32.mrf.mxu0 }
 0x168   :  { %191 = vadd.xlane.f32.xlu1 %v160_v14 }
 0x169   :  { %v162_v15 = vpop.f32.mrf.mxu0 }
 0x16b   :  { %v163_v16 = vpop.f32.mrf.mxu0 }
 0x1ef   :  { %v168_v17 = vpop.xlane.xlu0 %167 }
 0x1f0   :  { %v170_v18 = vmul.f32 0.0078125, %v168_v17 }
 0x1f1   :  { %v192_v19 = vpop.xlane.xlu1 %191 }
 0x1f2   :  { %v171_v20 = vsub.f32 %v158_v13, %v170_v18  ;;  %v193_v21 = vmul.f32 0.0078125, %v192_v19 }
 0x1f4   :  { %v194_v22 = vsub.f32 %v160_v14, %v193_v21  ;;  %v172_v23 = vmul.f32 %v171_v20, %v171_v20 }
 0x1f6   :  { %173 = vadd.xlane.f32.xlu1 %v172_v23  ;;  %v195_v24 = vmul.f32 %v194_v22, %v194_v22 }
 0x1fa   :  { %196 = vadd.xlane.f32.xlu1 %v195_v24 }
 0x20b   :  { %70 = vrot.lane.b32.xlu1 %v66_v1, %s498_s2 }
 0x27f   :  { %v174_v25 = vpop.xlane.xlu1 %173 }
 0x280   :  { %v175_v26 = vmul.f32 0.0078125, %v174_v25 }
 0x282   :  { %v176_v27 = vadd.f32 1e-05, %v175_v26 }
 0x283   :  { %v197_v28 = vpop.xlane.xlu1 %196 }
 0x284   :  { %369 = vrsqrt.f32 %v176_v27  ;;  %v198_v29 = vmul.f32 0.0078125, %v197_v28 }
 0x286   :  { %v199_v30 = vadd.f32 1e-05, %v198_v29 }
 0x287   :  { %v71_v31 = vpop.permute.xlu1 %70 }
 0x288   :  { %371 = vrsqrt.f32 %v199_v30  ;;  %73 = vst.msk [vmem:[#allocation3] sm:$0xff] %vm67_vm0, %v71_v31 }
 0x28f   :  { %v75_v53 = vld [vmem:[#allocation3] sm:$0xff] }
 0x291   :  { %v370_v32 = vpop.eup %369 }
 0x292   :  { %v178_v33 = vmul.f32 %v370_v32, %v171_v20 }
 0x294   :  { %v183_v37 = vmul.f32 %v341_v34, %v178_v33 }
 0x295   :  { %v372_v35 = vpop.eup %371 }
 0x296   :  { %v201_v38 = vmul.f32 %v372_v35, %v194_v22  ;;  %v188_v42 = vadd.f32 %v342_v39, %v183_v37 }
 0x298   :  { %v206_v41 = vmul.f32 %v343_v36, %v201_v38 }
 0x29a   :  { %v211_v43 = vadd.f32 %v344_v40, %v206_v41 }
 0x29c   :  { %v212_v44 = vadd.f32 %v211_v43, %v188_v42 }
 0x29e   :  { %v345_v45 = vmul.f32 -1.442695, %v212_v44 }
 0x2a0   :  { %373 = vpow2.f32 %v345_v45 }
 0x2a1   :  { %375 = vtanh.f32 %v212_v44 }
 0x2ad   :  { %v374_v46 = vpop.eup %373 }
 0x2ae   :  { %v222_v47 = vadd.f32 1.0, %v374_v46  ;;  %v376_v50 = vpop.eup %375 }
 0x2b0   :  { %377 = vrcp.f32 %v222_v47 }
 0x2bd   :  { %v378_v51 = vpop.eup %377 }
 0x2be   :  { %v225_v52 = vsel %vm217_vm5, %v376_v50, %v378_v51 }
 0x2bf   :  { %232 = vrot.lane.b32.xlu1 %v225_v52, %s499_s21 }
 0x2c3   :  { %227 = vrot.lane.b32.xlu1 %v75_v53, %s500_s3 }
 0x331   :  { %v233_v54 = vpop.permute.xlu1 %232 }
 0x332   :  { %v235_v55 = vmul.f32 %v233_v54, %v225_v52 }
 0x334   :  { %237 = vrot.lane.b32.xlu0 %v235_v55, %s500_s3 }
 0x335   :  { %v228_v56 = vpop.permute.xlu1 %227 }
 0x336   :  { %v230_v57 = vmul.f32 %v228_v56, %v225_v52 }
 0x3a6   :  { %v238_v58 = vpop.permute.xlu0 %237 }
 0x3a7   :  { %v240_v59 = vadd.f32 %v238_v58, %v230_v57 }
 0x3a9   :  { %244 = vrot.lane.b32.xlu1 %v240_v59, %s498_s2 }
 0x41b   :  { %v245_v60 = vpop.permute.xlu1 %244 }
 0x41c   :  { %v248_v61 = vsel %vm67_vm0, %v245_v60, 0.0 }
 0x41d   :  { %249 = vadd.xlane.f32.xlu1 %v248_v61 }
 0x42e   :  { %271 = vrot.lane.b32.xlu1 %v346_v62, %s500_s3 }
 0x4a6   :  { %v250_v63 = vpop.xlane.xlu1 %249 }
 0x4a7   :  { %v252_v0 = vmul.f32 0.03125, %v250_v63 }
 0x4a9   :  { %v253_v1 = vsub.f32 %v240_v59, %v252_v0 }
 0x4aa   :  { %v272_v10 = vpop.permute.xlu1 %271 }
 0x4ab   :  { %v254_v2 = vmul.f32 %v253_v1, %v253_v1 }
 0x4ad   :  { %256 = vrot.lane.b32.xlu0 %v254_v2, %s498_s2 }
 0x51f   :  { %v257_v3 = vpop.permute.xlu0 %256 }
 0x520   :  { %v259_v4 = vsel %vm67_vm0, %v257_v3, 0.0 }
 0x521   :  { %260 = vadd.xlane.f32.xlu0 %v259_v4 }
 0x537   :  { %280 = vrot.lane.b32.xlu0 %v347_v5, %s500_s3 }
 0x5aa   :  { %v261_v6 = vpop.xlane.xlu0 %260 }
 0x5ab   :  { %v262_v7 = vmul.f32 0.03125, %v261_v6 }
 0x5ad   :  { %v263_v8 = vadd.f32 1e-05, %v262_v7 }
 0x5ae   :  { %v281_v12 = vpop.permute.xlu0 %280 }
 0x5af   :  { %379 = vrsqrt.f32 %v263_v8 }
 0x5bc   :  { %v380_v9 = vpop.eup %379 }
 0x5bd   :  { %v265_v11 = vmul.f32 %v380_v9, %v253_v1 }
 0x5bf   :  { %v274_v13 = vmul.f32 %v272_v10, %v265_v11 }
 0x5c1   :  { %v283_v14 = vadd.f32 %v281_v12, %v274_v13 }
 0x5c3   :  { %381 = vtanh.f32 %v283_v14 }
 0x5d0   :  { %v382_v15 = vpop.eup %381 }
 0x5d1   :  { %286 = vrot.lane.b32.xlu1 %v382_v15, %s499_s21 }
 0x643   :  { %v287_v16 = vpop.permute.xlu1 %286 }
 0x644   :  { %v289_v17 = vmul.f32 %v287_v16, %v225_v52 }
 0x646   :  { %291 = vrot.lane.b32.xlu1 %v289_v17, %s500_s3 }
 0x64a   :  { %296 = vrot.lane.b32.xlu1 %v283_v14, %s498_s2 }
 0x6b8   :  { %v292_v18 = vpop.permute.xlu1 %291 }
 0x6b9   :  { %294 = vst.msk [vmem:[#allocation2] sm:$0xff] %vm67_vm0, %v292_v18  ;;  %v301_v19 = vsel %vm67_vm0, %v292_v18, %v283_v14  ;;  %300 = vst.msk [vmem:[#allocation10] sm:$0xff] %vm67_vm0, %v292_v18 }
 0x6ba   :  { %454 = shalt.err (!%p451_p5)
}
 0x6bb   :  { %313 = dma.vmem_to_hbm [thread:$0]  %s311_s26, 128, %s595_s5, [#allocation6]   ;;  %303 = vst.msk [vmem:[#allocation11] sm:$0xff] %vm302_vm6, %v301_v19 }
 0x6bc   :  { %s463_s8 = scalar_lea.vmem %s321_s28, 128  ;;  %p468_p7 = scmp.lt.s32.totalorder %s321_s28, %s321_s28 }
 0x6bd   :  { %p464_p6 = scmp.ne.s32.totalorder %s321_s28, %s463_s8  ;;  %p469_p8 = scmp.lt.s32.totalorder %s463_s8, %s463_s8 }
 0x6bf   :  { %p470_p9 = por %p469_p8, %p468_p7 }
 0x6c1   :  { %p471_p10 = pnand %p470_p9, %p464_p6 }
 0x6c3   :  { %474 = shalt.err (!%p471_p10)
}
 0x6c4   :  { %323 = dma.vmem_to_hbm [thread:$0]  %s321_s28, 128, %s596_s6, [#allocation12]   ;;  %v297_v20 = vpop.permute.xlu1 %296 }
 0x6c5   :  { %299 = vst.msk [vmem:[#allocation3] sm:$0xff] %vm67_vm0, %v297_v20 }
 0x6c6   :  { %487 = dma.done.wait [#allocation6], 128  }
 0x6c7   :  { %488 = vsyncadd [#allocation6], 4294967168 }
 0x6c8   :  { %489 = dma.done.wait [#allocation12], 128  }
 0x6c9   :  { %490 = vsyncadd [#allocation12], 4294967168 }
 0x6ca   :  { %330 = vsyncpa [#allocation5], 1 }
 0x6cb   :  { %331 = vsyncpa [#allocation8], 1 }
 0x6cc   :  { %332 = vsyncpa [#allocation6], 1 }
 0x6cd   :  { %333 = vsyncpa [#allocation12], 1 }

</bundles_post_ra>
